<compile_context>
chip_gen: v7x
topology: tpu7x:2x2x1
jax: 0.10.0
libtpu: 0.0.40
codegen_flags: <defaults>
</compile_context>

<pallas_src>
import math
import jax
import jax.numpy as jnp
from jax.experimental import pallas as pl
from jax.experimental.pallas import tpu as pltpu


def _round_up(x, m):
    return ((x + m - 1) // m) * m


def _default_tiles():
    """Generation-aware default (tm, tn, tk)."""
    kind = ""
    try:
        kind = jax.devices()[0].device_kind.lower()
    except Exception:
        pass
    if "v5" in kind:
        return 512, 512, 1024     # v5e: ~240 FLOP/byte crossover, 16 MiB scoped VMEM
    if "v6" in kind:
        return 1024, 768, 1024    # v6e: push intensity toward the ~600 FLOP/byte roofline
    if "v7" in kind:
        return 768, 768, 1024     # v7x: 64 MiB physical VMEM per TC, ~310 FLOP/byte needed
    return 512, 512, 1024


def _fused_qkv_kernel(x_ref, w_ref, b_ref, o_ref, acc_ref):
    # x_ref: (tm, tk), w_ref: (tk, tn), b_ref: (1, tn), o_ref: (tm, tn)
    # acc_ref: (tm, tn) f32 VMEM accumulator, resident across the K axis.
    k = pl.program_id(2)

    @pl.when(k == 0)
    def _():
        # Fold the bias into the accumulator init (no epilogue add).
        acc_ref[...] = jnp.broadcast_to(
            b_ref[...].astype(jnp.float32), acc_ref.shape
        )

    acc_ref[...] += jnp.dot(
        x_ref[...], w_ref[...], preferred_element_type=jnp.float32
    )

    @pl.when(k == pl.num_programs(2) - 1)
    def _():
        o_ref[...] = acc_ref[...].astype(o_ref.dtype)


def make_mqa_qkv_projection(wq, bq, wkv, bkv, head_dim,
                            *, tm=None, tn=None, tk=None, compute_dtype=None):
    """Build the fused projection once; returns project(hidden_states)->(q,k,v).

    wq: [H, H], wkv: [H, 2*head_dim] (weights already in 'in x out' layout,
    i.e. the transpose of torch Linear storage), bq: [H], bkv: [2*head_dim].
    """
    H = wq.shape[0]
    assert wq.shape == (H, H)
    kv_dim = 2 * head_dim
    assert wkv.shape == (H, kv_dim)
    n_out = H + kv_dim

    dtm, dtn, dtk = _default_tiles()
    tm = dtm if tm is None else tm
    tn = dtn if tn is None else tn
    tk = dtk if tk is None else tk
    compute_dtype = wq.dtype if compute_dtype is None else compute_dtype

    # N/K tile sizes are fixed by the parameter shapes -> resolve them here.
    tn = min(tn, _round_up(n_out, 128))
    np_ = _round_up(n_out, tn)
    tk = min(tk, _round_up(H, 128))
    kp = _round_up(H, tk)

    # Fuse + pad + cast the weights/bias ONCE (hoisted out of the forward path).
    w = jnp.concatenate([wq, wkv], axis=1).astype(compute_dtype)     # [H, n_out]
    b = jnp.concatenate([bq, bkv]).reshape(1, n_out).astype(jnp.float32)
    if kp > H or np_ > n_out:
        w = jnp.pad(w, ((0, kp - H), (0, np_ - n_out)))
    if np_ > n_out:
        b = jnp.pad(b, ((0, 0), (0, np_ - n_out)))
    w = jax.device_put(w)
    b = jax.device_put(b)

    wsz = jnp.dtype(compute_dtype).itemsize

    def project(hidden_states):
        B, S, Hx = hidden_states.shape
        assert Hx == H
        M = B * S
        out_dtype = hidden_states.dtype
        in_dtype = hidden_states.dtype
        isz = jnp.dtype(in_dtype).itemsize
        osz = jnp.dtype(out_dtype).itemsize

        # Row tile: sublane-aligned (8 for f32, 16 for bf16), shrunk for tiny M.
        # TODO(synk): on v7x cap tm so the M grid axis has >=2 blocks (2 TCs).
        sub = 16 if in_dtype == jnp.bfloat16 else 8
        tm_eff = min(tm, _round_up(M, sub))
        mp = _round_up(M, tm_eff)

        x2d = hidden_states.reshape(M, H)
        if mp > M or kp > H:
            x2d = jnp.pad(x2d, ((0, mp - M), (0, kp - H)))

        # VMEM budget: double-buffered x/W/bias/out tiles + f32 accumulator.
        vmem_bytes = (2 * tm_eff * tk * isz + 2 * tk * tn * wsz + 2 * tn * 4
                      + 2 * tm_eff * tn * osz + tm_eff * tn * 4)
        vmem_limit = min(max(2 * vmem_bytes, 32 << 20), 64 << 20)

        cost = pl.CostEstimate(
            flops=2 * M * H * n_out,
            transcendentals=0,
            bytes_accessed=(M * H * isz + H * n_out * wsz
                            + n_out * 4 + M * n_out * osz),
        )

        out2d = pl.pallas_call(
            _fused_qkv_kernel,
            out_shape=jax.ShapeDtypeStruct((mp, np_), out_dtype),
            grid_spec=pltpu.PrefetchScalarGridSpec(
                num_scalar_prefetch=0,
                grid=(mp // tm_eff, np_ // tn, kp // tk),
                in_specs=[
                    pl.BlockSpec((tm_eff, tk), lambda i, j, k: (i, k)),  # x tile
                    pl.BlockSpec((tk, tn), lambda i, j, k: (k, j)),      # W tile
                    pl.BlockSpec((1, tn), lambda i, j, k: (0, j)),       # bias tile
                ],
                out_specs=pl.BlockSpec((tm_eff, tn), lambda i, j, k: (i, j)),
                scratch_shapes=[pltpu.VMEM((tm_eff, tn), jnp.float32)],
            ),
            compiler_params=pltpu.CompilerParams(
                dimension_semantics=("parallel", "parallel", "arbitrary"),
                vmem_limit_bytes=int(vmem_limit),
            ),
            cost_estimate=cost,
        )(x2d, w, b)

        if mp > M or np_ > n_out:
            out2d = out2d[:M, :n_out]
        query = out2d[:, :H].reshape(B, S, H)
        key = out2d[:, H:H + head_dim].reshape(B, S, head_dim)
        value = out2d[:, H + head_dim:n_out].reshape(B, S, head_dim)
        return query, key, value

    return project


if __name__ == "__main__":
    # Config (mirrors CommonConfig fields used by the module), small shapes.
    batch = 2
    seq = 8
    n_embd = 32           # global_hidden_size
    n_head = 4
    n_layer = 2
    initializer_range = 0.02
    add_bias = True
    head_dim = n_embd // n_head   # 8

    key = jax.random.PRNGKey(0)
    k_x, k_wq, k_bq, k_wkv, k_bkv = jax.random.split(key, 5)

    # q_attn: ColumnParallelLinear(n_embd, n_embd), std = initializer_range
    std_q = initializer_range
    # kv_attn: ReplicatedLinear(n_embd, 2*head_dim),
    #          std = initializer_range / sqrt(2*n_layer)
    std_kv = initializer_range / math.sqrt(2 * n_layer)

    # PyTorch Linear stores weight as [out, in]; build directly in [in, out]
    # layout (the transpose) for the kernel matmul.
    wq = jax.random.normal(k_wq, (n_embd, n_embd), jnp.float32) * std_q
    bq = (jax.random.normal(k_bq, (n_embd,), jnp.float32) * std_q) if add_bias \
        else jnp.zeros((n_embd,), jnp.float32)
    wkv = jax.random.normal(k_wkv, (n_embd, 2 * head_dim), jnp.float32) * std_kv
    bkv = (jax.random.normal(k_bkv, (2 * head_dim,), jnp.float32) * std_kv) if add_bias \
        else jnp.zeros((2 * head_dim,), jnp.float32)

    hidden_states = jax.random.normal(k_x, (batch, seq, n_embd), jnp.float32)

    # Build the fused/padded parameters once, then run the projection.
    project = make_mqa_qkv_projection(wq, bq, wkv, bkv, head_dim)
    q, k, v = project(hidden_states)
    jax.block_until_ready((q, k, v))

    # Reference check against plain JAX.
    q_ref = hidden_states @ wq + bq
    kv_ref = hidden_states @ wkv + bkv
    k_ref, v_ref = jnp.split(kv_ref, 2, axis=-1)
    assert q.shape == (batch, seq, n_embd)
    assert k.shape == (batch, seq, head_dim)
    assert v.shape == (batch, seq, head_dim)
    assert jnp.allclose(q, q_ref, atol=1e-5)
    assert jnp.allclose(k, k_ref, atol=1e-5)
    assert jnp.allclose(v, v_ref, atol=1e-5)

    print("KERNEL_OK")
</pallas_src>

<mosaic_0001>
module attributes {stable_mosaic.version = 11 : i64} {
  func.func @_fused_qkv_kernel(%arg0: i32, %arg1: i32, %arg2: i32, %arg3: memref<16x128xf32, #tpu.memory_space<vmem>>, %arg4: memref<128x128xf32, #tpu.memory_space<vmem>>, %arg5: memref<1x128xf32, #tpu.memory_space<vmem>>, %arg6: memref<16x128xf32, #tpu.memory_space<vmem>>, %arg7: memref<16x128xf32, #tpu.memory_space<vmem>>) attributes {dimension_semantics = [#tpu.dimension_semantics<parallel>, #tpu.dimension_semantics<parallel>, #tpu.dimension_semantics<arbitrary>], iteration_bounds = array<i64: 1, 1, 1>, scalar_prefetch = 0 : i64, scratch_operands = 1 : i64, tpu.core_type = #tpu.core_type<tc>, window_params = [{transform_indices = @transform_0, window_bounds = array<i64: 16, 128>}, {transform_indices = @transform_1, window_bounds = array<i64: 128, 128>}, {transform_indices = @transform_2, window_bounds = array<i64: 1, 128>}, {transform_indices = @transform_3, window_bounds = array<i64: 16, 128>}]} {
    %c0_i32 = arith.constant 0 : i32
    %0 = arith.cmpi eq, %arg2, %c0_i32 : i32
    %1 = arith.extui %0 : i1 to i32
    %c0_i32_0 = arith.constant 0 : i32
    %2 = arith.cmpi ne, %1, %c0_i32_0 : i32
    scf.if %2 {
      %c0_10 = arith.constant 0 : index
      %c0_11 = arith.constant 0 : index
      %12 = vector.load %arg5[%c0_10, %c0_11] : memref<1x128xf32, #tpu.memory_space<vmem>>, vector<1x128xf32>
      %13 = vector.shape_cast %12 : vector<1x128xf32> to vector<1x128xf32>
      %14 = vector.broadcast %13 : vector<1x128xf32> to vector<16x128xf32>
      %c0_12 = arith.constant 0 : index
      %c0_13 = arith.constant 0 : index
      %15 = vector.load %arg7[%c0_12, %c0_13] : memref<16x128xf32, #tpu.memory_space<vmem>>, vector<16x128xf32>
      tpu.vector_store %arg7[%c0_12, %c0_13], %14 {strides = array<i32>} : memref<16x128xf32, #tpu.memory_space<vmem>>, vector<16x128xf32>,
    } else {
    }
    %c0 = arith.constant 0 : index
    %c0_1 = arith.constant 0 : index
    %3 = vector.load %arg7[%c0, %c0_1] : memref<16x128xf32, #tpu.memory_space<vmem>>, vector<16x128xf32>
    %c0_2 = arith.constant 0 : index
    %c0_3 = arith.constant 0 : index
    %4 = vector.load %arg3[%c0_2, %c0_3] : memref<16x128xf32, #tpu.memory_space<vmem>>, vector<16x128xf32>
    %c0_4 = arith.constant 0 : index
    %c0_5 = arith.constant 0 : index
    %5 = vector.load %arg4[%c0_4, %c0_5] : memref<128x128xf32, #tpu.memory_space<vmem>>, vector<128x128xf32>
    %cst = arith.constant dense<0.000000e+00> : vector<16x128xf32>
    %6 = tpu.matmul %4, %5, %cst {dimension_numbers = #tpu.dot_dimension_numbers<[1], [0], [0], [1], [0, 0, 1, 1], [], []>} : vector<16x128xf32>, vector<128x128xf32>, vector<16x128xf32> -> vector<16x128xf32>
    %7 = arith.addf %3, %6 : vector<16x128xf32>
    %c0_6 = arith.constant 0 : index
    %c0_7 = arith.constant 0 : index
    %8 = vector.load %arg7[%c0_6, %c0_7] : memref<16x128xf32, #tpu.memory_space<vmem>>, vector<16x128xf32>
    tpu.vector_store %arg7[%c0_6, %c0_7], %7 {strides = array<i32>} : memref<16x128xf32, #tpu.memory_space<vmem>>, vector<16x128xf32>,
    %c0_i32_8 = arith.constant 0 : i32
    %9 = arith.cmpi eq, %arg2, %c0_i32_8 : i32
    %10 = arith.extui %9 : i1 to i32
    %c0_i32_9 = arith.constant 0 : i32
    %11 = arith.cmpi ne, %10, %c0_i32_9 : i32
    scf.if %11 {
      %c0_10 = arith.constant 0 : index
      %c0_11 = arith.constant 0 : index
      %12 = vector.load %arg7[%c0_10, %c0_11] : memref<16x128xf32, #tpu.memory_space<vmem>>, vector<16x128xf32>
      %c0_12 = arith.constant 0 : index
      %c0_13 = arith.constant 0 : index
      %13 = vector.load %arg6[%c0_12, %c0_13] : memref<16x128xf32, #tpu.memory_space<vmem>>, vector<16x128xf32>
      tpu.vector_store %arg6[%c0_12, %c0_13], %12 {strides = array<i32>} : memref<16x128xf32, #tpu.memory_space<vmem>>, vector<16x128xf32>,
    } else {
    }
    return
  }
  func.func @transform_0(%arg0: i32, %arg1: i32, %arg2: i32) -> (i32, i32) {
    %c0_i32 = arith.constant 0 : i32
    return %arg0, %arg2 : i32, i32
  }
  func.func @transform_1(%arg0: i32, %arg1: i32, %arg2: i32) -> (i32, i32) {
    %c0_i32 = arith.constant 0 : i32
    return %arg2, %arg1 : i32, i32
  }
  func.func @transform_2(%arg0: i32, %arg1: i32, %arg2: i32) -> (i32, i32) {
    %c0_i32 = arith.constant 0 : i32
    %c0_i32_0 = arith.constant 0 : i32
    return %c0_i32, %arg1 : i32, i32
  }
  func.func @transform_3(%arg0: i32, %arg1: i32, %arg2: i32) -> (i32, i32) {
    %c0_i32 = arith.constant 0 : i32
    return %arg0, %arg1 : i32, i32
  }
}

</mosaic_0001>

<bundles_post_ra>
// kernel: tpu_custom_call.1
= control target key start
LH: loop header
LB: loop body
LE: loop exit
PB: predicated region body
PF: predicated region fallthrough
CT: control target
= control target key end

     0   :  { %8 = vsyncpa [#allocation4], 0  ;;  %s416_s0 = inlined_call_operand.hbm [shape: f32[16,128], index: 0, kind: input, shape index: {}]   ;;  %s417_s1 = inlined_call_operand.hbm [shape: f32[128,128], index: 1, kind: input, shape index: {}]   ;;  %s418_s2 = inlined_call_operand.vmem [shape: f32[1,128], index: 2, kind: input, shape index: {}]   ;;  %s419_s3 = inlined_call_operand.hbm [shape: f32[16,128], index: 3, kind: output, shape index: {}]  }
   0x1   :  { %9 = vsyncpa [#allocation7], 0 }
   0x2   :  { %10 = vsyncpa [#allocation5], 0  ;;  %s343_s12 = smov [#allocation3]   ;;  %s271_s16 = scalar_lea.hbm %s416_s0, 256 }
   0x3   :  { %s16_s13 = sshll.u32 %s343_s12, 4  ;;  %p272_p0 = scmp.ne.s32.totalorder %s416_s0, %s271_s16  ;;  %s17_s13 = int_to_ptr.vmem [resolvable:$true] %s16_s13 }
   0x4   :  { %p275_p1 = scmp.lt.u32.totalorder %s271_s16, %s416_s0 }
   0x6   :  { %p277_p2 = pnand %p275_p1, %p272_p0 }
   0x8   :  { %280 = shalt.err (!%p277_p2)
}
   0x9   :  { %s281_s21 = scalar_lea.vmem %s17_s13, 256  ;;  %p286_p4 = scmp.lt.s32.totalorder %s17_s13, %s17_s13 }
   0xa   :  { %p282_p3 = scmp.ne.s32.totalorder %s17_s13, %s281_s21  ;;  %p287_p5 = scmp.lt.s32.totalorder %s281_s21, %s281_s21 }
   0xc   :  { %p288_p6 = por %p287_p5, %p286_p4 }
   0xe   :  { %p289_p7 = pnand %p288_p6, %p282_p3 }
  0x10   :  { %292 = shalt.err (!%p289_p7)
}
  0x11   :  { %s344_s22 = smov 128   ;;  %s345_s23 = smov 8  }
  0x12   :  { %22 = dma.hbm_to_vmem [thread:$0]  %s416_s0, 256, %s17_s13, [#allocation4], %s344_s22, %s344_s22, %s345_s23  }
  0x13   :  { %s346_s26 = smov [#allocation6]   ;;  %s293_s30 = scalar_lea.hbm %s417_s1, 2048 }
  0x14   :  { %s28_s27 = sshll.u32 %s346_s26, 4  ;;  %p294_p8 = scmp.ne.s32.totalorder %s417_s1, %s293_s30  ;;  %s29_s27 = int_to_ptr.vmem [resolvable:$true] %s28_s27 }
  0x15   :  { %p297_p9 = scmp.lt.u32.totalorder %s293_s30, %s417_s1 }
  0x17   :  { %p299_p10 = pnand %p297_p9, %p294_p8 }
  0x19   :  { %302 = shalt.err (!%p299_p10)
}
  0x1a   :  { %s303_s8 = scalar_lea.vmem %s29_s27, 2048  ;;  %p308_p12 = scmp.lt.s32.totalorder %s29_s27, %s29_s27 }
  0x1b   :  { %p304_p11 = scmp.ne.s32.totalorder %s29_s27, %s303_s8  ;;  %p309_p13 = scmp.lt.s32.totalorder %s303_s8, %s303_s8 }
  0x1d   :  { %p310_p0 = por %p309_p13, %p308_p12 }
  0x1f   :  { %p311_p1 = pnand %p310_p0, %p304_p11 }
  0x21   :  { %314 = shalt.err (!%p311_p1)
}
  0x22   :  { %34 = dma.hbm_to_vmem [thread:$0]  %s417_s1, 2048, %s29_s27, [#allocation7], %s344_s22, %s344_s22, %s345_s23  }
  0x23   :  { %337 = dma.done.wait [#allocation4], 256  }
  0x24   :  { %338 = vsyncadd [#allocation4], 4294967040 }
  0x25   :  { %339 = dma.done.wait [#allocation7], 2048  }
  0x26   :  { %340 = vsyncadd [#allocation7], 4294965248  ;;  %v60_v0 = vld [vmem:[#allocation6] sm:$0xff]  ;;  %v61_v1 = vld [vmem:[#allocation6 + $0x8] sm:$0xff]  ;;  %s347_s11 = smov [#allocation8]  }
  0x27   :  { %v62_v2 = vld [vmem:[#allocation6 + $0x10] sm:$0xff]  ;;  %v234_v3 = vpack.c.bf16 %v61_v1, %v60_v0  ;;  %v63_v4 = vld [vmem:[#allocation6 + $0x18] sm:$0xff]  ;;  %v64_v6 = vld [vmem:[#allocation6 + $0x20] sm:$0xff]  ;;  %s167_s12 = sshll.u32 %s347_s11, 4  ;;  %s168_s12 = int_to_ptr.vmem [resolvable:$true] %s167_s12 }
  0x28   :  { %v238_v5 = vpack.c.bf16 %v63_v4, %v62_v2  ;;  %v65_v7 = vld [vmem:[#allocation6 + $0x28] sm:$0xff]  ;;  %v58_v9 = vld [vmem:[#allocation3] sm:$0xff]  ;;  %v67_v11 = vld [vmem:[#allocation6 + $0x38] sm:$0xff]  ;;  %s315_s13 = scalar_lea.vmem %s168_s12, 256  ;;  %p320_p3 = scmp.lt.s32.totalorder %s168_s12, %s168_s12 }
  0x29   :  { %235 = vmatprep.subr.bf16.mxu0 %v234_v3  ;;  %v242_v8 = vpack.c.bf16 %v65_v7, %v64_v6  ;;  %v66_v10 = vld [vmem:[#allocation6 + $0x30] sm:$0xff]  ;;  %231 = vmatprep.mubr.f32.mxu0 %v58_v9  ;;  %v68_v13 = vld [vmem:[#allocation6 + $0x40] sm:$0xff]  ;;  %v69_v14 = vld [vmem:[#allocation6 + $0x48] sm:$0xff]  ;;  %p316_p2 = scmp.ne.s32.totalorder %s168_s12, %s315_s13  ;;  %p321_p4 = scmp.lt.s32.totalorder %s315_s13, %s315_s13 }
  0x2a   :  { %237 = vmatpush3.bf16.msra.mxu0 %v234_v3  ;;  %v246_v12 = vpack.c.bf16 %v67_v11, %v66_v10  ;;  %v250_v15 = vpack.c.bf16 %v69_v14, %v68_v13  ;;  %v70_v16 = vld [vmem:[#allocation6 + $0x50] sm:$0xff]  ;;  %v71_v17 = vld [vmem:[#allocation6 + $0x58] sm:$0xff]  ;;  %v72_v19 = vld [vmem:[#allocation6 + $0x60] sm:$0xff] }
  0x2b   :  { %239 = vmatprep.subr.bf16.mxu0 %v238_v5  ;;  %v254_v18 = vpack.c.bf16 %v71_v17, %v70_v16  ;;  %v73_v20 = vld [vmem:[#allocation6 + $0x68] sm:$0xff]  ;;  %v74_v22 = vld [vmem:[#allocation6 + $0x70] sm:$0xff]  ;;  %v75_v23 = vld [vmem:[#allocation6 + $0x78] sm:$0xff]  ;;  %p322_p5 = por %p321_p4, %p320_p3 }
  0x2c   :  { %v258_v21 = vpack.c.bf16 %v73_v20, %v72_v19  ;;  %v262_v24 = vpack.c.bf16 %v75_v23, %v74_v22  ;;  %v59_v25 = vld [vmem:[#allocation3 + $0x8] sm:$0xff]  ;;  %v180_v26 = vld [vmem:[%s418_s2] ss:$0 sm:$0xff] }
  0x2d   :  { %p323_p6 = pnand %p322_p5, %p316_p2 }
  0x2e   :  { %241 = vmatpush3.bf16.msra.mxu0 %v238_v5 }
  0x2f   :  { %243 = vmatprep.subr.bf16.mxu0 %v242_v8 }
  0x32   :  { %245 = vmatpush3.bf16.msra.mxu0 %v242_v8 }
  0x33   :  { %247 = vmatprep.subr.bf16.mxu0 %v246_v12 }
  0x36   :  { %249 = vmatpush3.bf16.msra.mxu0 %v246_v12 }
  0x37   :  { %251 = vmatprep.subr.bf16.mxu0 %v250_v15 }
  0x3a   :  { %253 = vmatpush3.bf16.msra.mxu0 %v250_v15 }
  0x3b   :  { %255 = vmatprep.subr.bf16.mxu0 %v254_v18 }
  0x3e   :  { %257 = vmatpush3.bf16.msra.mxu0 %v254_v18 }
  0x3f   :  { %259 = vmatprep.subr.bf16.mxu0 %v258_v21 }
  0x42   :  { %261 = vmatpush3.bf16.msra.mxu0 %v258_v21 }
  0x43   :  { %263 = vmatprep.subr.bf16.mxu0 %v262_v24 }
  0x46   :  { %265 = vmatpush3.bf16.msra.mxu0 %v262_v24 }
  0x49   :  { %232 = vmatmul.mubr.f32.vlgmr.msra.gmra.mrb[0].mxu0 %v59_v25 }
 0x11c   :  { %v233_v27 = vpop.f32.mrb[0].mxu0 }
 0x11d   :  { %v152_v28 = vadd.f32 %v233_v27, %v180_v26  ;;  %v142_v29 = vpop.f32.mrb[1].mxu0 }
 0x11e   :  { %v151_v30 = vadd.f32 %v180_v26, %v142_v29 }
 0x11f   :  { %161 = vst [vmem:[#allocation8 + $0x8] sm:$0xff] %v152_v28 }
 0x120   :  { %160 = vst [vmem:[#allocation8] sm:$0xff] %v151_v30 }
 0x121   :  { %326 = shalt.err (!%p323_p6)
}
 0x122   :  { %s327_s2 = scalar_lea.hbm %s419_s3, 256 }
 0x123   :  { %p328_p7 = scmp.ne.s32.totalorder %s419_s3, %s327_s2  ;;  %p331_p8 = scmp.lt.u32.totalorder %s327_s2, %s419_s3 }
 0x125   :  { %p333_p9 = pnand %p331_p8, %p328_p7 }
 0x127   :  { %336 = shalt.err (!%p333_p9)
}
 0x128   :  { %173 = dma.vmem_to_hbm [thread:$0]  %s168_s12, 256, %s419_s3, [#allocation5], %s344_s22, %s344_s22, %s345_s23  }
 0x129   :  { %341 = dma.done.wait [#allocation5], 256  }
 0x12a   :  { %342 = vsyncadd [#allocation5], 4294967040 }
 0x12b   :  { %177 = vsyncpa [#allocation4], 1 }
 0x12c   :  { %178 = vsyncpa [#allocation7], 1 }
 0x12d   :  { %179 = vsyncpa [#allocation5], 1 }

</bundles_post_ra>
